<compile_context>
chip_gen: v6e
topology: v6e:2x2x1
jax: 0.10.0
libtpu: 0.0.40
codegen_flags: <defaults>
</compile_context>

<pallas_src>
import functools

import jax
import jax.numpy as jnp
from jax.experimental import pallas as pl
from jax.experimental.pallas import tpu as pltpu


def ddpg_qnet_kernel(x_ref, w0_ref, b0_ref, w1_ref, b1_ref, w2_ref, b2_ref, o_ref,
                     *, act_dtype):
    # x tile: (TB, K) f32 -> bf16 for the MXU; accumulate in f32.
    x = x_ref[...].astype(jnp.bfloat16)

    z0 = jnp.dot(x, w0_ref[...], preferred_element_type=jnp.float32) + b0_ref[...]
    h0 = jnp.tanh(z0.astype(act_dtype))            # bf16 tanh on v6e/v7x, f32 on v5e

    z1 = jnp.dot(h0.astype(jnp.bfloat16), w1_ref[...],
                 preferred_element_type=jnp.float32) + b1_ref[...]
    h1 = jnp.tanh(z1.astype(act_dtype))

    # Final 128 -> 1 layer: VPU multiply + cross-lane reduce (f32), stored as a
    # (TB, 1) column -> masked width-1 stores on the idle vst slot, no relayout.
    q = jnp.sum(h1.astype(jnp.float32) * w2_ref[...], axis=-1, keepdims=True)
    o_ref[...] = (q + b2_ref[0, 0]).astype(o_ref.dtype)


def _round_up(x, m):
    return ((x + m - 1) // m) * m


def _cdiv(a, b):
    return -(-a // b)


def _device_kind():
    try:
        return jax.devices()[0].device_kind.lower()
    except Exception:  # pragma: no cover - detection is best-effort only
        return ""


def ddpg_qnet_forward(x, params, tile_b=4096):
    """x: [B, state_dim + action_dim] float32 (or bfloat16). Returns [B, 1] float32."""
    w0, b0, w1, b1, w2, b2 = params
    B, K = x.shape
    H0 = w0.shape[1]   # 256
    H1 = w1.shape[1]   # 128

    kind = _device_kind()
    # v5e has no bf16 VPU/EUP -> keep activations in f32 there; bf16 tanh elsewhere.
    act_dtype = jnp.float32 if "v5" in kind else jnp.bfloat16
    megacore = "v7" in kind  # 2 TensorCores per chip

    # --- batch tiling -------------------------------------------------------
    n_tiles = max(1, _cdiv(B, tile_b))
    # On megacore chips make sure there is an even number of >=2 grid steps so the
    # "parallel" batch axis actually uses both TensorCores (skip for tiny batches).
    if megacore and (n_tiles % 2 == 1) and B >= 256:
        n_tiles += 1
    TB = _round_up(_cdiv(B, n_tiles), 8)           # sublane-aligned tile
    B_pad = TB * n_tiles
    if B_pad != B:
        x = jnp.pad(x, ((0, B_pad - B), (0, 0)))

    # --- resident weights ---------------------------------------------------
    w0b = w0.astype(jnp.bfloat16)
    w1b = w1.astype(jnp.bfloat16)
    b0f = b0.reshape(1, H0).astype(jnp.float32)
    b1f = b1.reshape(1, H1).astype(jnp.float32)
    w2row = jnp.reshape(w2, (1, H1)).astype(jnp.float32)   # final layer on VPU in f32
    b2s = jnp.reshape(b2, (1, 1)).astype(jnp.float32)      # scalar, lives in SMEM

    const2d = lambda i: (0, 0)   # weights/biases: same block every grid step (resident)

    cost = pl.CostEstimate(
        flops=2 * B_pad * (K * H0 + H0 * H1 + H1),
        transcendentals=B_pad * (H0 + H1),
        bytes_accessed=(B_pad * K * x.dtype.itemsize + B_pad * 4
                        + (K * H0 + H0 * H1) * 2
                        + (H0 + H1 + H1 + 1) * 4),
    )

    kernel = functools.partial(ddpg_qnet_kernel, act_dtype=act_dtype)

    out = pl.pallas_call(
        kernel,
        out_shape=jax.ShapeDtypeStruct((B_pad, 1), jnp.float32),
        grid=(n_tiles,),
        in_specs=[
            pl.BlockSpec((TB, K), lambda i: (i, 0)),             # x: batch-tiled
            pl.BlockSpec((K, H0), const2d),                      # w0 (bf16, resident)
            pl.BlockSpec((1, H0), const2d),                      # b0 (f32, resident)
            pl.BlockSpec((H0, H1), const2d),                     # w1 (bf16, resident)
            pl.BlockSpec((1, H1), const2d),                      # b1 (f32, resident)
            pl.BlockSpec((1, H1), const2d),                      # w2 row (f32, resident)
            pl.BlockSpec(memory_space=pltpu.MemorySpace.SMEM),   # b2 scalar
        ],
        out_specs=pl.BlockSpec((TB, 1), lambda i: (i, 0)),       # (TB,1) column output
        compiler_params=pltpu.CompilerParams(
            dimension_semantics=("parallel",),                   # megacore on v7x
            vmem_limit_bytes=32 * 1024 * 1024,                   # safe on v5e/v6e/v7x
        ),
        cost_estimate=cost,
    )(x, w0b, b0f, w1b, b1f, w2row, b2s)

    return out[:B]


def init_params(key, state_dim, action_dim):
    """Deterministic init matching nn.Linear's default (uniform +/- 1/sqrt(fan_in))."""
    dims = [(state_dim + action_dim, 256), (256, 128), (128, 1)]
    params = []
    keys = jax.random.split(key, 2 * len(dims))
    for i, (fan_in, fan_out) in enumerate(dims):
        bound = 1.0 / jnp.sqrt(float(fan_in))
        w = jax.random.uniform(
            keys[2 * i], (fan_in, fan_out), jnp.float32, -bound, bound
        )
        b = jax.random.uniform(
            keys[2 * i + 1], (1, fan_out), jnp.float32, -bound, bound
        )
        params += [w, b]
    return tuple(params)


def reference_forward(x, params):
    w0, b0, w1, b1, w2, b2 = params
    h0 = jnp.tanh(x @ w0 + b0)
    h1 = jnp.tanh(h0 @ w1 + b1)
    return h1 @ w2 + b2


if __name__ == "__main__":
    state_dim, action_dim, batch = 16, 8, 2
    key = jax.random.PRNGKey(0)
    k_params, k_x = jax.random.split(key)
    params = init_params(k_params, state_dim, action_dim)
    x = jax.random.normal(k_x, (batch, state_dim + action_dim), jnp.float32)

    out = ddpg_qnet_forward(x, params)
    out = jax.block_until_ready(out)

    ref = reference_forward(x, params)
    assert out.shape == (batch, 1)
    # bf16 matmul operands / bf16 tanh on v6e+ (f32 accumulation) -> relaxed tolerance.
    assert jnp.allclose(out, ref, atol=3e-2, rtol=3e-2), (out, ref)
    print("KERNEL_OK")
</pallas_src>

<mosaic_0001>
module attributes {stable_mosaic.version = 11 : i64} {
  func.func @ddpg_qnet_kernel(%arg0: i32, %arg1: memref<8x24xf32, #tpu.memory_space<vmem>>, %arg2: memref<24x256xbf16, #tpu.memory_space<vmem>>, %arg3: memref<1x256xf32, #tpu.memory_space<vmem>>, %arg4: memref<256x128xbf16, #tpu.memory_space<vmem>>, %arg5: memref<1x128xf32, #tpu.memory_space<vmem>>, %arg6: memref<1x128xf32, #tpu.memory_space<vmem>>, %arg7: memref<1x1xf32, #tpu.memory_space<smem>>, %arg8: memref<8x1xf32, #tpu.memory_space<vmem>>) attributes {dimension_semantics = [#tpu.dimension_semantics<parallel>], iteration_bounds = array<i64: 1>, scalar_prefetch = 0 : i64, scratch_operands = 0 : i64, tpu.core_type = #tpu.core_type<tc>, window_params = [{transform_indices = @transform_0, window_bounds = array<i64: 8, 24>}, {pipeline_mode = #tpu.pipeline_mode<synchronous>, transform_indices = @transform_1, window_bounds = array<i64: 24, 256>}, {pipeline_mode = #tpu.pipeline_mode<synchronous>, transform_indices = @transform_2, window_bounds = array<i64: 1, 256>}, {pipeline_mode = #tpu.pipeline_mode<synchronous>, transform_indices = @transform_3, window_bounds = array<i64: 256, 128>}, {pipeline_mode = #tpu.pipeline_mode<synchronous>, transform_indices = @transform_4, window_bounds = array<i64: 1, 128>}, {pipeline_mode = #tpu.pipeline_mode<synchronous>, transform_indices = @transform_5, window_bounds = array<i64: 1, 128>}, {transform_indices = @transform_6, window_bounds = array<i64: 1, 1>}, {transform_indices = @transform_7, window_bounds = array<i64: 8, 1>}]} {
    %c0 = arith.constant 0 : index
    %c0_0 = arith.constant 0 : index
    %0 = vector.load %arg1[%c0, %c0_0] : memref<8x24xf32, #tpu.memory_space<vmem>>, vector<8x24xf32>
    %1 = arith.truncf %0 : vector<8x24xf32> to vector<8x24xbf16>
    %c0_1 = arith.constant 0 : index
    %c0_2 = arith.constant 0 : index
    %2 = vector.load %arg2[%c0_1, %c0_2] : memref<24x256xbf16, #tpu.memory_space<vmem>>, vector<24x256xbf16>
    %cst = arith.constant dense<0.000000e+00> : vector<8x256xf32>
    %3 = tpu.matmul %1, %2, %cst {dimension_numbers = #tpu.dot_dimension_numbers<[1], [0], [0], [1], [0, 0, 1, 1], [], []>} : vector<8x24xbf16>, vector<24x256xbf16>, vector<8x256xf32> -> vector<8x256xf32>
    %c0_3 = arith.constant 0 : index
    %c0_4 = arith.constant 0 : index
    %4 = vector.load %arg3[%c0_3, %c0_4] : memref<1x256xf32, #tpu.memory_space<vmem>>, vector<1x256xf32>
    %5 = vector.broadcast %4 : vector<1x256xf32> to vector<8x256xf32>
    %6 = arith.addf %3, %5 : vector<8x256xf32>
    %7 = arith.truncf %6 : vector<8x256xf32> to vector<8x256xbf16>
    %8 = math.tanh %7 : vector<8x256xbf16>
    %c0_5 = arith.constant 0 : index
    %c0_6 = arith.constant 0 : index
    %9 = vector.load %arg4[%c0_5, %c0_6] : memref<256x128xbf16, #tpu.memory_space<vmem>>, vector<256x128xbf16>
    %cst_7 = arith.constant dense<0.000000e+00> : vector<8x128xf32>
    %10 = tpu.matmul %8, %9, %cst_7 {dimension_numbers = #tpu.dot_dimension_numbers<[1], [0], [0], [1], [0, 0, 1, 1], [], []>} : vector<8x256xbf16>, vector<256x128xbf16>, vector<8x128xf32> -> vector<8x128xf32>
    %c0_8 = arith.constant 0 : index
    %c0_9 = arith.constant 0 : index
    %11 = vector.load %arg5[%c0_8, %c0_9] : memref<1x128xf32, #tpu.memory_space<vmem>>, vector<1x128xf32>
    %12 = vector.broadcast %11 : vector<1x128xf32> to vector<8x128xf32>
    %13 = arith.addf %10, %12 : vector<8x128xf32>
    %14 = arith.truncf %13 : vector<8x128xf32> to vector<8x128xbf16>
    %15 = math.tanh %14 : vector<8x128xbf16>
    %16 = arith.extf %15 : vector<8x128xbf16> to vector<8x128xf32>
    %c0_10 = arith.constant 0 : index
    %c0_11 = arith.constant 0 : index
    %17 = vector.load %arg6[%c0_10, %c0_11] : memref<1x128xf32, #tpu.memory_space<vmem>>, vector<1x128xf32>
    %18 = vector.broadcast %17 : vector<1x128xf32> to vector<8x128xf32>
    %19 = arith.mulf %16, %18 : vector<8x128xf32>
    %cst_12 = arith.constant dense<0.000000e+00> : vector<8xf32>
    %20 = vector.multi_reduction <add>, %19, %cst_12 [1] : vector<8x128xf32> to vector<8xf32>
    %21 = vector.shape_cast %20 : vector<8xf32> to vector<8x1xf32>
    %c0_13 = arith.constant 0 : index
    %c0_14 = arith.constant 0 : index
    %22 = memref.load %arg7[%c0_13, %c0_14] : memref<1x1xf32, #tpu.memory_space<smem>>
    %23 = vector.broadcast %22 : f32 to vector<8x1xf32>
    %24 = arith.addf %21, %23 : vector<8x1xf32>
    %c0_15 = arith.constant 0 : index
    %c0_16 = arith.constant 0 : index
    %25 = vector.load %arg8[%c0_15, %c0_16] : memref<8x1xf32, #tpu.memory_space<vmem>>, vector<8x1xf32>
    tpu.vector_store %arg8[%c0_15, %c0_16], %24 {strides = array<i32>} : memref<8x1xf32, #tpu.memory_space<vmem>>, vector<8x1xf32>,
    return
  }
  func.func @transform_0(%arg0: i32) -> (i32, i32) {
    %c0_i32 = arith.constant 0 : i32
    %c0_i32_0 = arith.constant 0 : i32
    return %arg0, %c0_i32 : i32, i32
  }
  func.func @transform_1(%arg0: i32) -> (i32, i32) {
    %c0_i32 = arith.constant 0 : i32
    %c0_i32_0 = arith.constant 0 : i32
    %c0_i32_1 = arith.constant 0 : i32
    return %c0_i32, %c0_i32_0 : i32, i32
  }
  func.func @transform_2(%arg0: i32) -> (i32, i32) {
    %c0_i32 = arith.constant 0 : i32
    %c0_i32_0 = arith.constant 0 : i32
    %c0_i32_1 = arith.constant 0 : i32
    return %c0_i32, %c0_i32_0 : i32, i32
  }
  func.func @transform_3(%arg0: i32) -> (i32, i32) {
    %c0_i32 = arith.constant 0 : i32
    %c0_i32_0 = arith.constant 0 : i32
    %c0_i32_1 = arith.constant 0 : i32
    return %c0_i32, %c0_i32_0 : i32, i32
  }
  func.func @transform_4(%arg0: i32) -> (i32, i32) {
    %c0_i32 = arith.constant 0 : i32
    %c0_i32_0 = arith.constant 0 : i32
    %c0_i32_1 = arith.constant 0 : i32
    return %c0_i32, %c0_i32_0 : i32, i32
  }
  func.func @transform_5(%arg0: i32) -> (i32, i32) {
    %c0_i32 = arith.constant 0 : i32
    %c0_i32_0 = arith.constant 0 : i32
    %c0_i32_1 = arith.constant 0 : i32
    return %c0_i32, %c0_i32_0 : i32, i32
  }
  func.func @transform_6(%arg0: i32) -> (i32, i32) {
    %c0_i32 = arith.constant 0 : i32
    %c0_i32_0 = arith.constant 0 : i32
    %c0_i32_1 = arith.constant 0 : i32
    return %c0_i32, %c0_i32_0 : i32, i32
  }
  func.func @transform_7(%arg0: i32) -> (i32, i32) {
    %c0_i32 = arith.constant 0 : i32
    %c0_i32_0 = arith.constant 0 : i32
    return %arg0, %c0_i32 : i32, i32
  }
}

</mosaic_0001>

<bundles_post_ra>
// kernel: tpu_custom_call.1
= control target key start
LH: loop header
LB: loop body
LE: loop exit
PB: predicated region body
PF: predicated region fallthrough
CT: control target
= control target key end

     0   :  { %13 = vsyncpa [#allocation4], 0  ;;  %s571_s0 = inlined_call_operand.hbm [shape: f32[8,24], index: 0, kind: input, shape index: {}]   ;;  %s572_s1 = inlined_call_operand.hbm [shape: bf16[24,256], index: 1, kind: input, shape index: {}]   ;;  %s573_s2 = inlined_call_operand.vmem [shape: f32[1,256], index: 2, kind: input, shape index: {}]   ;;  %s574_s3 = inlined_call_operand.hbm [shape: bf16[256,128], index: 3, kind: input, shape index: {}]   ;;  %s575_s4 = inlined_call_operand.vmem [shape: f32[1,128], index: 4, kind: input, shape index: {}]   ;;  %s576_s5 = inlined_call_operand.vmem [shape: f32[1,128], index: 5, kind: input, shape index: {}]   ;;  %s577_s6 = inlined_call_operand.<no memory space> [shape: f32[1,1], index: 6, kind: input, shape index: {}]   ;;  %s578_s7 = inlined_call_operand.vmem [shape: f32[8,1], index: 7, kind: output, shape index: {}]  }
   0x1   :  { %14 = vsyncpa [#allocation6], 0  ;;  %s499_s24 = smov [#allocation5]  }
   0x2   :  { %s30_s25 = sshll.u32 %s499_s24, 4  ;;  %s31_s25 = int_to_ptr.vmem [resolvable:$true] %s30_s25 }
   0x3   :  { %s443_s26 = scalar_lea.vmem %s31_s25, 384  ;;  %p448_p1 = scmp.lt.s32.totalorder %s31_s25, %s31_s25 }
   0x4   :  { %p444_p0 = scmp.ne.s32.totalorder %s31_s25, %s443_s26  ;;  %p449_p2 = scmp.lt.s32.totalorder %s443_s26, %s443_s26 }
   0x6   :  { %p450_p3 = por %p449_p2, %p448_p1 }
   0x8   :  { %p451_p4 = pnand %p450_p3, %p444_p0 }
   0xa   :  { %454 = shalt.err (!%p451_p4)
}
   0xb   :  { %s500_s27 = smov 128   ;;  %s501_s28 = smov 8  }
   0xc   :  { %36 = dma.hbm_to_vmem [thread:$0]  %s572_s1, 384, %s31_s25, [#allocation6], %s500_s27, %s500_s27, %s501_s28  }
   0xd   :  { %s502_s8 = smov [#allocation3]   ;;  %s503_s10 = smov [#allocation7]  }
   0xe   :  { %s21_s9 = sshll.u32 %s502_s8, 4  ;;  %s44_s11 = sshll.u32 %s503_s10, 4  ;;  %s22_s9 = int_to_ptr.vmem [resolvable:$true] %s21_s9  ;;  %s45_s11 = int_to_ptr.vmem [resolvable:$true] %s44_s11 }
   0xf   :  { %s463_s12 = scalar_lea.vmem %s22_s9, 128  ;;  %p468_p6 = scmp.lt.s32.totalorder %s22_s9, %s22_s9 }
  0x10   :  { %p464_p5 = scmp.ne.s32.totalorder %s22_s9, %s463_s12  ;;  %p469_p7 = scmp.lt.s32.totalorder %s463_s12, %s463_s12 }
  0x12   :  { %p470_p8 = por %p469_p7, %p468_p6 }
  0x14   :  { %p471_p9 = pnand %p470_p8, %p464_p5 }
  0x16   :  { %474 = shalt.err (!%p471_p9)
}
  0x17   :  { %24 = dma.hbm_to_vmem [thread:$0]  %s571_s0, 128, %s22_s9, [#allocation4]  }
  0x18   :  { %s483_s15 = scalar_lea.vmem %s45_s11, 2048  ;;  %p488_p11 = scmp.lt.s32.totalorder %s45_s11, %s45_s11 }
  0x19   :  { %p484_p10 = scmp.ne.s32.totalorder %s45_s11, %s483_s15  ;;  %p489_p12 = scmp.lt.s32.totalorder %s483_s15, %s483_s15 }
  0x1b   :  { %p490_p13 = por %p489_p12, %p488_p11 }
  0x1d   :  { %p491_p0 = pnand %p490_p13, %p484_p10 }
  0x1f   :  { %494 = shalt.err (!%p491_p0)
}
  0x20   :  { %s504_s1 = smov 64   ;;  %s505_s16 = smov 4  }
  0x21   :  { %50 = dma.hbm_to_vmem [thread:$0]  %s574_s3, 2048, %s45_s11, [#allocation6], %s504_s1, %s504_s1, %s505_s16  }
  0x22   :  { %495 = dma.done.wait [#allocation4], 128  }
  0x23   :  { %496 = vsyncadd [#allocation4], 4294967168 }
  0x24   :  { %497 = dma.done.wait [#allocation6], 2432  }
  0x25   :  { %498 = vsyncadd [#allocation6], 4294964864  ;;  %v506_v0 = vmov 0   ;;  %v71_v1 = vld [vmem:[#allocation5 + $0x10] sm:$0xff]  ;;  %vm103_vm0 = vcmask 1043456   ;;  %v67_v6 = vld [vmem:[#allocation3] sm:$0xff]  ;;  %v74_v25 = vlaneseq  ;;  %v344_v54 = vstv %s577_s6 }
  0x26   :  { %142 = vmatprep.mubr.bf16.mxu0 %v506_v0  ;;  %v357_v2 = vcombine.high %v71_v1, %v71_v1  ;;  %v356_v3 = vcombine.low %v71_v1, %v71_v1  ;;  %v410_v4 = vld [vmem:[#allocation5 + $0x4] ss:$8 sps:$4 sm:$0xff]   ;;  %v412_v5 = vld [vmem:[#allocation5] ss:$8 sps:$4 sm:$0xff]   ;;  %v413_v7 = vld [vmem:[#allocation7 + $0x78] sm:$0xff]   ;;  %v68_v13 = vpack.c.bf16 %v67_v6, %v67_v6  ;;  %vm99_vm1 = vcmask 195584  }
  0x27   :  { %v414_v9 = vld [vmem:[#allocation7 + $0x38] sm:$0xff]   ;;  %378 = vmatprep.subr.bf16.mxu1 %v413_v7  ;;  %v415_v10 = vld [vmem:[#allocation7 + $0x70] sm:$0xff]   ;;  %v417_v12 = vld [vmem:[#allocation7 + $0x68] sm:$0xff]   ;;  %v75_v26 = vshrl.u32 %v74_v25, 7  ;;  %vm346_vm2 = vcmask 7168  }
  0x28   :  { %358 = vmatprep.subr.msk.bf16.mxu0 %vm103_vm0, %v357_v2  ;;  %v105_v8 = vsel %vm103_vm0, %v356_v3, 0  ;;  %379 = vmatpush3.bf16.msra.mxu1 %v414_v9  ;;  %v416_v11 = vld [vmem:[#allocation7 + $0x30] sm:$0xff]   ;;  %v418_v14 = vld [vmem:[#allocation7 + $0x28] sm:$0xff]   ;;  %v419_v15 = vld [vmem:[#allocation7 + $0x60] sm:$0xff]  }
  0x29   :  { %123 = vmatpush1.bf16.msra.mxu0 %v105_v8  ;;  %380 = vmatprep.subr.bf16.mxu1 %v415_v10  ;;  %v420_v16 = vld [vmem:[#allocation7 + $0x20] sm:$0xff]   ;;  %v421_v17 = vld [vmem:[#allocation7 + $0x58] sm:$0xff]   ;;  %v423_v19 = vld [vmem:[#allocation7 + $0x50] sm:$0xff]   ;;  %v76_v27 = vsub.s32 0, %v75_v26  ;;  %v80_v29 = vsub.s32 1, %v75_v26 }
  0x2a   :  { %124 = vmatprep.subr.bf16.mxu0 %v410_v4  ;;  %v422_v18 = vld [vmem:[#allocation7 + $0x18] sm:$0xff]   ;;  %v424_v20 = vld [vmem:[#allocation7 + $0x10] sm:$0xff]   ;;  %v425_v21 = vld [vmem:[#allocation7 + $0x48] sm:$0xff]  }
  0x2b   :  { %v426_v22 = vld [vmem:[#allocation7 + $0x8] sm:$0xff]   ;;  %v427_v23 = vld [vmem:[#allocation7 + $0x40] sm:$0xff]  }
  0x2c   :  { %381 = vmatpush3.bf16.msra.mxu1 %v416_v11  ;;  %v428_v24 = vld [vmem:[#allocation7] sm:$0xff]  }
  0x2d   :  { %125 = vmatpush1.bf16.msra.mxu0 %v412_v5  ;;  %382 = vmatprep.subr.bf16.mxu1 %v417_v12  ;;  %v72_v28 = vld [vmem:[%s573_s2] sm:$0x3] }
  0x2e   :  { %v77_v30 = vrot.slane %v72_v28, %v76_v27  ;;  %v81_v31 = vrot.slane %v72_v28, %v80_v29  ;;  %v360_v43 = vld [vmem:[%s575_s4] ss:$0 sm:$0xff] }
  0x2f   :  { %v377_v51 = vld [vmem:[%s576_s5] ss:$0 sm:$0xff] }
  0x30   :  { %359 = vmatmul.mubr.msk.bf16.vlgmr.msra.gmra.mxu0 %vm99_vm1, %v68_v13  ;;  %383 = vmatpush3.bf16.msra.mxu1 %v418_v14 }
  0x31   :  { %384 = vmatprep.subr.bf16.mxu1 %v419_v15 }
  0x34   :  { %385 = vmatpush3.bf16.msra.mxu1 %v420_v16 }
  0x35   :  { %386 = vmatprep.subr.bf16.mxu1 %v421_v17 }
  0x38   :  { %387 = vmatpush3.bf16.msra.mxu1 %v422_v18 }
  0x39   :  { %388 = vmatprep.subr.bf16.mxu1 %v423_v19 }
  0x3c   :  { %389 = vmatpush3.bf16.msra.mxu1 %v424_v20 }
  0x3d   :  { %390 = vmatprep.subr.bf16.mxu1 %v425_v21 }
  0x40   :  { %391 = vmatpush3.bf16.msra.mxu1 %v426_v22 }
  0x41   :  { %392 = vmatprep.subr.bf16.mxu1 %v427_v23 }
  0x44   :  { %393 = vmatpush3.bf16.msra.mxu1 %v428_v24 }
  0xf0   :  { %v144_v32 = vpop.f32.mrf.mxu0 }
  0xf1   :  { %v145_v33 = vadd.f32 %v144_v32, %v77_v30 }
  0xf2   :  { %v146_v34 = vpop.f32.mrf.mxu0 }
  0xf3   :  { %v147_v35 = vadd.f32 %v146_v34, %v81_v31  ;;  %v151_v36 = vpack.c.bf16 %v145_v33, %v145_v33 }
  0xf4   :  { %v148_v37 = vpop.f32.mrf.mxu0 }
  0xf5   :  { %v152_v38 = vpack.c.bf16 %v147_v35, %v147_v35 }
  0xf6   :  { %v149_v39 = vpop.f32.mrf.mxu0 }
  0xf7   :  { %429 = vtanh.bf16 %v152_v38 }
  0xf8   :  { %431 = vtanh.bf16 %v151_v36 }
 0x105   :  { %v430_v40 = vpop.eup %429 }
 0x106   :  { %v432_v41 = vpop.eup %431  ;;  %322 = vmatprep.mubr.bf16.mxu1 %v430_v40 }
 0x107   :  { %323 = vmatmul.mubr.bf16.vlgmr.msra.gmra.mxu1 %v432_v41 }
 0x1c7   :  { %v394_v42 = vpop.f32.mrf.mxu1 }
 0x1c9   :  { %v395_v44 = vpop.f32.mrf.mxu1 }
 0x1ca   :  { %v396_v45 = vadd.f32 %v395_v44, %v394_v42 }
 0x1cb   :  { %v397_v46 = vpop.f32.mrf.mxu1 }
 0x1cc   :  { %v325_v47 = vadd.f32 %v396_v45, %v360_v43 }
 0x1cd   :  { %v398_v48 = vpop.f32.mrf.mxu1 }
 0x1ce   :  { %v330_v49 = vpack.c.bf16 %v325_v47, %v325_v47 }
 0x1d0   :  { %433 = vtanh.bf16 %v330_v49 }
 0x1de   :  { %v434_v50 = vpop.eup %433 }
 0x1df   :  { %v332_v52 = vunpack.c.l.bf16 %v434_v50 }
 0x1e1   :  { %v340_v53 = vmul.f32 %v377_v51, %v332_v52 }
 0x1e3   :  { %341 = vadd.xlane.f32.xlu0 %v340_v53 }
 0x26c   :  { %v342_v55 = vpop.xlane.xlu0 %341 }
 0x26d   :  { %v345_v56 = vadd.f32 %v344_v54, %v342_v55 }
 0x26f   :  { %347 = vst.msk [vmem:[%s578_s7] sm:$0xff] %vm346_vm2, %v345_v56 }
 0x270   :  { %352 = vsyncpa [#allocation4], 1 }
 0x271   :  { %353 = vsyncpa [#allocation6], 1 }

</bundles_post_ra>
